<compile_context>
chip_gen: v7x
topology: tpu7x:2x2x1
jax: 0.10.0
libtpu: 0.0.40
codegen_flags: <defaults>
</compile_context>

<pallas_src>
import math

import jax
import jax.numpy as jnp
from jax import lax
from jax.experimental import pallas as pl
from jax.experimental.pallas import tpu as pltpu

_LANE = 128
_MAX_TM = 2048  # measured HBM-roofline sweeps saturate around 512-2048 rows


def _round_up(v, mult):
    return -(-int(v) // mult) * mult


def _sublane_mult(itemsize):
    # f32 tiles are (8,128); bf16 (16,128); int8/fp8 (32,128).
    return 8 * max(1, 4 // int(itemsize))


def _padded_bytes(rows, cols, itemsize):
    """Layout-padded VMEM footprint of a (rows, cols) tile."""
    rows = _round_up(max(int(rows), 1), _sublane_mult(itemsize))
    cols = _round_up(max(int(cols), 1), _LANE)
    return rows * cols * int(itemsize)


def _vmem_budget():
    """(planner budget, compiler vmem_limit_bytes), generation-aware."""
    phys = 64 * 1024 * 1024  # conservative default (v7x per-TC VMEM)
    try:
        info = pltpu.get_tpu_info()
        for attr in ("vmem_capacity_bytes", "vmem_size_bytes"):
            val = getattr(info, attr, None)
            if val:
                phys = int(val)
                break
    except Exception:
        pass
    # ~70% of physical for the planner, 75% as the compiler limit (slack covers
    # Mosaic internal scratch / semaphores / accounting slop).
    return int(phys * 0.70), int(phys * 0.75)


def _plan_tiles(m, k, n, x_isz, w_isz, o_isz, budget):
    """Pick (tm, tn, tk, weight_buffers) with layout-padded VMEM accounting."""

    def wbytes(tn_, tk_):
        return _padded_bytes(tn_, tk_, w_isz)

    def bbytes(tn_):
        return _padded_bytes(1, tn_, 4)  # bias stays f32

    # 1) Whole weight VMEM-resident (single-buffered) if it fits in ~60% budget.
    if wbytes(n, k) + bbytes(n) <= int(0.6 * budget):
        tn, tk, w_bufs = n, k, 1
    else:
        # 2) Stream the weight over an N grid axis.  TN multiple of 256 (native
        #    MXU width on v6e/v7x, still 128-aligned for v5e's 4x128x128 MXU).
        w_bufs = 2
        tk = k
        lane_k = _round_up(k, _LANE)
        tn = (int(0.4 * budget) // (w_bufs * lane_k * w_isz) // 256) * 256
        tn = max(256, tn)
        if w_bufs * (wbytes(tn, k) + bbytes(tn)) > int(0.5 * budget):
            # 3) Even one N tile of weight is too big -> also stream K
            #    (accumulator kernel, K axis innermost/"arbitrary").
            tn = 256
            rows_tn = _round_up(tn, _sublane_mult(w_isz))
            tk = (int(0.4 * budget) // (w_bufs * rows_tn * w_isz) // _LANE) * _LANE
            tk = max(_LANE, tk)
        if tn >= n:
            tn = n
        if tk >= k:
            tk = k

    k_tiled = tk < k

    resident = w_bufs * (wbytes(tn, tk) + bbytes(tn))
    avail = max(budget - resident, 1 << 20)
    # Double-buffered x and out tiles, plus the f32 accumulator if K is tiled.
    per_row = (2 * _round_up(tk, _LANE) * x_isz
               + 2 * _round_up(tn, _LANE) * o_isz)
    if k_tiled:
        per_row += _round_up(tn, _LANE) * 4
    tm = max(8, min(_MAX_TM, (avail // per_row // 8) * 8))
    if m >= 16:
        # Keep >= 2 M tiles so the "parallel" axis spans both TCs on v7x.
        tm = min(tm, _round_up(pl.cdiv(m, 2), 8))
    if tm >= m:
        tm = m  # single full-extent block (always layout-legal)
    return int(tm), int(tn), int(tk), int(w_bufs)


def transformer_linear_embedding(x, weight, bias, *, compute_dtype=None,
                                 precision=None):
    """y = x @ weight.T + bias over the last axis of x.

    x:      (..., input_depth)
    weight: (embedding_dim, input_depth)   (PyTorch nn.Linear convention)
    bias:   (embedding_dim,)
    compute_dtype: optional (e.g. jnp.bfloat16) cast of x/weight before the
        kernel; accumulation and bias add stay f32, output keeps x.dtype.
    precision: optional lax.Precision for the in-kernel dot_general
        (e.g. lax.Precision.HIGHEST for strict f32 nn.Linear parity).
    """
    emb_dim, in_depth = weight.shape
    lead_shape = x.shape[:-1]
    m = int(math.prod(lead_shape)) if lead_shape else 1
    out_dtype = x.dtype

    x2d = x.reshape(m, in_depth)
    w = weight
    if compute_dtype is not None and jnp.dtype(compute_dtype) != x2d.dtype:
        x2d = x2d.astype(compute_dtype)
        w = w.astype(compute_dtype)
    b2d = bias.astype(jnp.float32).reshape(1, emb_dim)

    budget, vmem_limit = _vmem_budget()
    tm, tn, tk, w_bufs = _plan_tiles(
        m, in_depth, emb_dim,
        x2d.dtype.itemsize, w.dtype.itemsize, jnp.dtype(out_dtype).itemsize,
        budget)

    # If K is tiled, zero-pad K so the partial last reduction block cannot feed
    # garbage into the accumulator (padded zeros contribute nothing).
    k_dim = in_depth
    if tk < in_depth:
        k_dim = _round_up(in_depth, tk)
        x2d = jnp.pad(x2d, ((0, 0), (0, k_dim - in_depth)))
        w = jnp.pad(w, ((0, 0), (0, k_dim - in_depth)))

    grid = (pl.cdiv(m, tm), pl.cdiv(emb_dim, tn), pl.cdiv(k_dim, tk))
    k_tiled = grid[2] > 1

    dn = (((1,), (1,)), ((), ()))  # contract K of x with K of W  ->  x @ W^T

    def _kernel_direct(x_ref, w_ref, b_ref, o_ref):
        # x_ref: (tm, tk)  w_ref: (tn, tk)  b_ref: (1, tn)  o_ref: (tm, tn)
        acc = lax.dot_general(x_ref[...], w_ref[...], dn,
                              preferred_element_type=jnp.float32,
                              precision=precision)
        o_ref[...] = (acc + b_ref[...]).astype(o_ref.dtype)

    def _kernel_kacc(x_ref, w_ref, b_ref, o_ref, acc_ref):
        kk = pl.program_id(2)

        @pl.when(kk == 0)
        def _init():
            acc_ref[...] = jnp.zeros_like(acc_ref)

        acc_ref[...] += lax.dot_general(x_ref[...], w_ref[...], dn,
                                        preferred_element_type=jnp.float32,
                                        precision=precision)

        @pl.when(kk == pl.num_programs(2) - 1)
        def _fin():
            o_ref[...] = (acc_ref[...] + b_ref[...]).astype(o_ref.dtype)

    kernel = _kernel_kacc if k_tiled else _kernel_direct
    scratch = [pltpu.VMEM((tm, tn), jnp.float32)] if k_tiled else []

    flops = 2 * m * k_dim * emb_dim
    bytes_accessed = (m * k_dim * x2d.dtype.itemsize
                      + emb_dim * k_dim * w.dtype.itemsize
                      + emb_dim * 4
                      + m * emb_dim * jnp.dtype(out_dtype).itemsize)

    def _call(single_buffer_resident):
        # Weight/bias have a constant index_map over the M axis; when they are
        # fully resident (no N/K tiling) a single buffer is enough.
        res_kw = ({"pipeline_mode": pl.Buffered(1)}
                  if single_buffer_resident else {})
        in_specs = [
            # x tile: pipelined (double-buffered) over M (and K if tiled).
            pl.BlockSpec((tm, tk), lambda i, j, kk: (i, kk)),
            # weight tile.
            pl.BlockSpec((tn, tk), lambda i, j, kk: (j, kk), **res_kw),
            # bias tile (kept f32).
            pl.BlockSpec((1, tn), lambda i, j, kk: (0, j), **res_kw),
        ]
        out_specs = pl.BlockSpec((tm, tn), lambda i, j, kk: (i, j))
        return pl.pallas_call(
            kernel,
            out_shape=jax.ShapeDtypeStruct((m, emb_dim), out_dtype),
            grid_spec=pltpu.PrefetchScalarGridSpec(
                num_scalar_prefetch=0,
                grid=grid,
                in_specs=in_specs,
                out_specs=out_specs,
                scratch_shapes=scratch,
            ),
            compiler_params=pltpu.CompilerParams(
                # M / N tiles independent -> megacore-shardable; K is reduction.
                dimension_semantics=("parallel", "parallel", "arbitrary"),
                vmem_limit_bytes=vmem_limit,
            ),
            cost_estimate=pl.CostEstimate(
                flops=flops, transcendentals=0, bytes_accessed=bytes_accessed),
        )(x2d, w, b2d)

    want_single = (w_bufs == 1) and hasattr(pl, "Buffered")
    if want_single:
        try:
            out = _call(True)
        except Exception:
            # Installed Pallas does not accept Buffered(1); fall back to the
            # default double-buffered resident weight.
            out = _call(False)
    else:
        out = _call(False)

    return out.reshape(*lead_shape, emb_dim)


if __name__ == "__main__":
    input_depth = 5
    embedding_dim = 12
    batch, seq = 2, 8

    key = jax.random.PRNGKey(0)
    kx, kw, kb = jax.random.split(key, 3)

    # nn.Linear default init: U(-1/sqrt(fan_in), 1/sqrt(fan_in)).
    bound = 1.0 / math.sqrt(input_depth)
    weight = jax.random.uniform(
        kw, (embedding_dim, input_depth), jnp.float32, -bound, bound)
    bias = jax.random.uniform(kb, (embedding_dim,), jnp.float32, -bound, bound)

    x = jax.random.normal(kx, (batch, seq, input_depth), jnp.float32)

    y = transformer_linear_embedding(x, weight, bias)
    y = jax.block_until_ready(y)

    # Plain-JAX reference (same math as PyTorch nn.Linear).
    y_ref = x @ weight.T + bias
    assert y.shape == (batch, seq, embedding_dim)
    assert jnp.allclose(y, y_ref, atol=1e-4, rtol=1e-4), float(
        jnp.max(jnp.abs(y - y_ref)))

    print("KERNEL_OK")
</pallas_src>

<mosaic_0001>
module attributes {stable_mosaic.version = 11 : i64} {
  func.func @_kernel_direct(%arg0: i32, %arg1: i32, %arg2: i32, %arg3: memref<8x5xf32, #tpu.memory_space<vmem>>, %arg4: memref<12x5xf32, #tpu.memory_space<vmem>>, %arg5: memref<1x12xf32, #tpu.memory_space<vmem>>, %arg6: memref<8x12xf32, #tpu.memory_space<vmem>>) attributes {dimension_semantics = [#tpu.dimension_semantics<parallel>, #tpu.dimension_semantics<parallel>, #tpu.dimension_semantics<arbitrary>], iteration_bounds = array<i64: 2, 1, 1>, scalar_prefetch = 0 : i64, scratch_operands = 0 : i64, tpu.core_type = #tpu.core_type<tc>, window_params = [{transform_indices = @transform_0, window_bounds = array<i64: 8, 5>}, {pipeline_mode = #tpu.pipeline_mode<synchronous>, transform_indices = @transform_1, window_bounds = array<i64: 12, 5>}, {pipeline_mode = #tpu.pipeline_mode<synchronous>, transform_indices = @transform_2, window_bounds = array<i64: 1, 12>}, {transform_indices = @transform_3, window_bounds = array<i64: 8, 12>}]} {
    %c0 = arith.constant 0 : index
    %c0_0 = arith.constant 0 : index
    %0 = vector.load %arg3[%c0, %c0_0] : memref<8x5xf32, #tpu.memory_space<vmem>>, vector<8x5xf32>
    %c0_1 = arith.constant 0 : index
    %c0_2 = arith.constant 0 : index
    %1 = vector.load %arg4[%c0_1, %c0_2] : memref<12x5xf32, #tpu.memory_space<vmem>>, vector<12x5xf32>
    %cst = arith.constant dense<0.000000e+00> : vector<8x12xf32>
    %2 = tpu.matmul %0, %1, %cst {dimension_numbers = #tpu.dot_dimension_numbers<[1], [1], [0], [0], [0, 0, 1, 0], [], []>} : vector<8x5xf32>, vector<12x5xf32>, vector<8x12xf32> -> vector<8x12xf32>
    %c0_3 = arith.constant 0 : index
    %c0_4 = arith.constant 0 : index
    %3 = vector.load %arg5[%c0_3, %c0_4] : memref<1x12xf32, #tpu.memory_space<vmem>>, vector<1x12xf32>
    %4 = vector.broadcast %3 : vector<1x12xf32> to vector<8x12xf32>
    %5 = arith.addf %2, %4 : vector<8x12xf32>
    %c0_5 = arith.constant 0 : index
    %c0_6 = arith.constant 0 : index
    %6 = vector.load %arg6[%c0_5, %c0_6] : memref<8x12xf32, #tpu.memory_space<vmem>>, vector<8x12xf32>
    tpu.vector_store %arg6[%c0_5, %c0_6], %5 {strides = array<i32>} : memref<8x12xf32, #tpu.memory_space<vmem>>, vector<8x12xf32>,
    return
  }
  func.func @transform_0(%arg0: i32, %arg1: i32, %arg2: i32) -> (i32, i32) {
    %c0_i32 = arith.constant 0 : i32
    return %arg0, %arg2 : i32, i32
  }
  func.func @transform_1(%arg0: i32, %arg1: i32, %arg2: i32) -> (i32, i32) {
    %c0_i32 = arith.constant 0 : i32
    return %arg1, %arg2 : i32, i32
  }
  func.func @transform_2(%arg0: i32, %arg1: i32, %arg2: i32) -> (i32, i32) {
    %c0_i32 = arith.constant 0 : i32
    %c0_i32_0 = arith.constant 0 : i32
    return %c0_i32, %arg1 : i32, i32
  }
  func.func @transform_3(%arg0: i32, %arg1: i32, %arg2: i32) -> (i32, i32) {
    %c0_i32 = arith.constant 0 : i32
    return %arg0, %arg1 : i32, i32
  }
}

module attributes {stable_mosaic.version = 11 : i64} {
  func.func @_kernel_direct(%arg0: i32, %arg1: i32, %arg2: i32, %arg3: memref<8x5xf32, #tpu.memory_space<vmem>>, %arg4: memref<12x5xf32, #tpu.memory_space<vmem>>, %arg5: memref<1x12xf32, #tpu.memory_space<vmem>>, %arg6: memref<8x12xf32, #tpu.memory_space<vmem>>) attributes {dimension_semantics = [#tpu.dimension_semantics<parallel>, #tpu.dimension_semantics<parallel>, #tpu.dimension_semantics<arbitrary>], iteration_bounds = array<i64: 2, 1, 1>, scalar_prefetch = 0 : i64, scratch_operands = 0 : i64, tpu.core_type = #tpu.core_type<tc>, window_params = [{transform_indices = @transform_0, window_bounds = array<i64: 8, 5>}, {transform_indices = @transform_1, window_bounds = array<i64: 12, 5>}, {transform_indices = @transform_2, window_bounds = array<i64: 1, 12>}, {transform_indices = @transform_3, window_bounds = array<i64: 8, 12>}]} {
    %c0 = arith.constant 0 : index
    %c0_0 = arith.constant 0 : index
    %0 = vector.load %arg3[%c0, %c0_0] : memref<8x5xf32, #tpu.memory_space<vmem>>, vector<8x5xf32>
    %c0_1 = arith.constant 0 : index
    %c0_2 = arith.constant 0 : index
    %1 = vector.load %arg4[%c0_1, %c0_2] : memref<12x5xf32, #tpu.memory_space<vmem>>, vector<12x5xf32>
    %cst = arith.constant dense<0.000000e+00> : vector<8x12xf32>
    %2 = tpu.matmul %0, %1, %cst {dimension_numbers = #tpu.dot_dimension_numbers<[1], [1], [0], [0], [0, 0, 1, 0], [], []>} : vector<8x5xf32>, vector<12x5xf32>, vector<8x12xf32> -> vector<8x12xf32>
    %c0_3 = arith.constant 0 : index
    %c0_4 = arith.constant 0 : index
    %3 = vector.load %arg5[%c0_3, %c0_4] : memref<1x12xf32, #tpu.memory_space<vmem>>, vector<1x12xf32>
    %4 = vector.broadcast %3 : vector<1x12xf32> to vector<8x12xf32>
    %5 = arith.addf %2, %4 : vector<8x12xf32>
    %c0_5 = arith.constant 0 : index
    %c0_6 = arith.constant 0 : index
    %6 = vector.load %arg6[%c0_5, %c0_6] : memref<8x12xf32, #tpu.memory_space<vmem>>, vector<8x12xf32>
    tpu.vector_store %arg6[%c0_5, %c0_6], %5 {strides = array<i32>} : memref<8x12xf32, #tpu.memory_space<vmem>>, vector<8x12xf32>,
    return
  }
  func.func @transform_0(%arg0: i32, %arg1: i32, %arg2: i32) -> (i32, i32) {
    %c0_i32 = arith.constant 0 : i32
    return %arg0, %arg2 : i32, i32
  }
  func.func @transform_1(%arg0: i32, %arg1: i32, %arg2: i32) -> (i32, i32) {
    %c0_i32 = arith.constant 0 : i32
    return %arg1, %arg2 : i32, i32
  }
  func.func @transform_2(%arg0: i32, %arg1: i32, %arg2: i32) -> (i32, i32) {
    %c0_i32 = arith.constant 0 : i32
    %c0_i32_0 = arith.constant 0 : i32
    return %c0_i32, %arg1 : i32, i32
  }
  func.func @transform_3(%arg0: i32, %arg1: i32, %arg2: i32) -> (i32, i32) {
    %c0_i32 = arith.constant 0 : i32
    return %arg0, %arg1 : i32, i32
  }
}

</mosaic_0001>

<bundles_post_ra>
// kernel: tpu_custom_call.1
= control target key start
LH: loop header
LB: loop body
LE: loop exit
PB: predicated region body
PF: predicated region fallthrough
CT: control target
= control target key end

     0   :  { %8 = vsyncpa [#allocation3], 0  ;;  %s770_s0 = inlined_call_operand.vmem [shape: f32[16,5], index: 0, kind: input, shape index: {}]   ;;  %s771_s1 = inlined_call_operand.vmem [shape: f32[12,5], index: 1, kind: input, shape index: {}]   ;;  %s772_s2 = inlined_call_operand.vmem [shape: f32[1,12], index: 2, kind: input, shape index: {}]   ;;  %s773_s3 = inlined_call_operand.hbm [shape: f32[16,12], index: 3, kind: output, shape index: {}]  }
   0x1   :  { %10 = vsyncpa [#allocation3 + $0x1], 0  ;;  %s649_s12 = smov 0   ;;  %s651_s13 = smov 0  }
   0x2   :  { %s653_s14 = smov 0   ;;  %s655_s15 = smov 0  }
   0x3   :  { %s657_s16 = smov 0   ;;  %s659_s17 = smov 0  }
   0x4 LB: > { %s456_s18 = sadd.s32 4294967295, %s623_s17   ;;  %s457_s19 = sadd.s32 4294967294, %s623_s17   ;;  %s623_s17 = sphi %s659_s17, %s16_s17   ;;  %s619_s16 = sphi %s657_s16, %s780_s16   ;;  %s615_s15 = sphi %s655_s15, %s779_s15   ;;  %s611_s14 = sphi %s653_s14, %s778_s14   ;;  %s607_s13 = sphi %s651_s13, %s777_s13   ;;  %s603_s12 = sphi %s649_s12, %s776_s12  }
   0x5   : > { %s35_s20 = sadd.s32 1, %s619_s16  ;;  %s126_s21 = sadd.s32 1, %s611_s14 }
   0x6   : > { %p37_p0 = scmp.ge.s32.totalorder %s35_s20, 2  ;;  %p136_p1 = scmp.ne.s32.totalorder %s611_s14, %s607_s13 }
   0x7   : > { %p137_p2 = scmp.eq.s32.totalorder %s456_s18, 1  ;;  %p142_p3 = scmp.ne.s32.totalorder %s607_s13, %s603_s12 }
   0x8   : > { %s782_s20 = smov (%p37_p0, %s35_s20), 0  ;;  %p143_p5 = scmp.eq.s32.totalorder %s457_s19, 1 }
   0x9   : > { %p689_p4 = por %p137_p2, %p136_p1  ;;  %s121_s23 = ssub.s32 %s619_s16, %s782_s20 }
   0xa   : > { %p462_p6 = scmp.ge.s32.totalorder %s623_s17, 1  ;;  %p124_p7 = scmp.eq.s32.totalorder %s121_s23, 0 }
   0xb   : > { %p696_p8 = por %p143_p5, %p142_p3  ;;  %p189_p9 = scmp.lt.s32.totalorder %s623_s17, 3 }
   0xc   : > { %s702_s25 = scalar_select %p124_p7, %s611_s14, %s126_s21  }
   0xd   : > { %p190_p10 = pnand %p462_p6, %p189_p9 }
   0xe   : > { %v246_v0 = vld [vmem:[%s771_s1] sm:$0xff] (!%p190_p10)  ;;  %v247_v1 = vld [vmem:[%s771_s1 + $0x8] sm:$0xf] (!%p190_p10)  ;;  %vm255_vm0 = vcmask (!%p190_p10), 39936   ;;  %v625_v2 = vmov (!%p190_p10), 0.0|0.0   ;;  %p226_p11 = scmp.lt.s32.totalorder (!%p190_p10), %s615_s15, 1 }
   0xf   : > { %193 = sbr.rel (%p190_p10) target bundleno = 255 (0xff), region = 32  ;;  %483 = vmatprep.subr.bf16.mxu0 (!%p190_p10), %v625_v2  ;;  %v484_v3 = vpack.c.bf16 (!%p190_p10), %v247_v1, %v246_v0  ;;  %vm485_vm1 = vmpackc.low (!%p190_p10), %vm255_vm0, %vm255_vm0  ;;  %vm626_vm2 = vmmov (!%p190_p10), 0   ;;  %v627_v4 = vmov (!%p190_p10), 0.0   ;;  %s223_s8 = sand.u32 (!%p190_p10), 1, %s607_s13   ;;  %v465_v6 = vld [vmem:[%s772_s2] ss:$0 sm:$0xff] (!%p190_p10) }
  0x10   : > { %480 = vmatprep.mubr.msk.f32.mxu0 (!%p190_p10), %vm626_vm2, %v627_v4  ;;  %s463_s9 = sshll.u32 (!%p190_p10), %s223_s8, 3  ;;  %s470_s18 = sshll.u32 (!%p190_p10), %s615_s15, 7  ;;  %vm335_vm3 = vcmask (!%p190_p10), 97280  }
  0x11   : > { %486 = vmatpush3.bf16.xpose.msk.msra.mxu0 (!%p190_p10), %vm485_vm1, %v484_v3  ;;  %s225_s19 = scalar_lea.vmem (!%p190_p10), [#allocation2], %s463_s9  ;;  %s723_s27 = scalar_lea.hbm (!%p190_p10), %s773_s3, %s470_s18 }
  0x12   : > { %s352_s21 = sshll.u32 (!%p190_p10), %s225_s19, 4  ;;  %s338_s28 = scalar_lea.sflag (!%p190_p10), [#allocation3], %s223_s8  ;;  %s725_s21 = int_to_ptr.vmem [resolvable:$true] %s352_s21 }
  0x13   : > { %s545_s29 = scalar_lea.vmem (!%p190_p10), %s725_s21, 128 }
  0x14   : > { %p546_p12 = scmp.ne.s32.totalorder (!%p190_p10), %s725_s21, %s545_s29 }
  0x16   : > { %s227_s30 = scalar_select %p226_p11, %s615_s15, 1 }
  0x17   : > { %p547_p13 = pnand %p546_p12, %p689_p4  ;;  %s628_s15 = smov [#allocation2]  }
  0x18   : > { %s464_s4 = sshll.u32 %s227_s30, 3  ;;  %s549_s30 = sshll.u32 %s628_s15, 4  ;;  %s550_s30 = int_to_ptr.vmem [resolvable:$false] %s549_s30 }
  0x19   : > { %s232_s7 = scalar_lea.vmem %s770_s0, %s464_s4  ;;  %p548_p0 = pneg %p547_p13 }
  0x1a   : > { %v245_v5 = vld [vmem:[%s232_s7] sm:$0xff]  ;;  %s551_s4 = scalar_lea.vmem %s550_s30, 256  ;;  %p552_p1 = scmp.lt.s32.totalorder %s725_s21, %s550_s30 }
  0x1b   : > { %481 = vmatmul.mubr.msk.f32.vlgmr.msra.gmra.mrb[0].mxu0 %vm255_vm0, %v245_v5  ;;  %p553_p2 = scmp.lt.s32.totalorder %s551_s4, %s545_s29 }
  0x1d   : > { %p554_p3 = por %p553_p2, %p552_p1 }
  0x1f   : > { %p555_p5 = pnand %p554_p3, %p548_p0 }
  0xee   : > { %v331_v7 = vpop.f32.mrb[0].mxu0 }
  0xef   : > { %v332_v8 = vadd.f32 %v465_v6, %v331_v7  ;;  %v482_v9 = vpop.f32.mrb[1].mxu0 }
  0xf1   : > { %336 = vst.msk [vmem:[%s225_s19] sm:$0xff] %vm335_vm3, %v332_v8 }
  0xf2   : > { %558 = shalt.err (!%p555_p5)
}
  0xf3   : > { %s559_s5 = scalar_lea.hbm %s723_s27, 128  ;;  %s563_s8 = scalar_lea.hbm %s773_s3, 256 }
  0xf4   : > { %p560_p6 = scmp.ne.s32.totalorder %s723_s27, %s559_s5  ;;  %p564_p10 = scmp.lt.u32.totalorder %s723_s27, %s773_s3 }
  0xf5   : > { %p565_p11 = scmp.lt.u32.totalorder %s563_s8, %s559_s5  ;;  %p567_p13 = scmp.lt.u32.totalorder %s559_s5, %s723_s27 }
  0xf6   : > { %p561_p7 = pnand %p560_p6, %p689_p4 }
  0xf7   : > { %p566_p12 = por %p565_p11, %p564_p10 }
  0xf8   : > { %p562_p9 = pneg %p561_p7 }
  0xf9   : > { %p568_p0 = por %p567_p13, %p566_p12 }
  0xfb   : > { %p569_p1 = pnand %p568_p0, %p562_p9 }
  0xfd   : > { %572 = shalt.err (!%p569_p1)
}
  0xfe   : > { %487 = dma.vmem_to_hbm [thread:$0]  (%p689_p4), %s725_s21, 128, %s723_s27, %s338_s28  }
  0xff PF: > { %p493_p2 = scmp.ge.s32.totalorder %s623_s17, 2  ;;  %s364_s11 = sand.u32 1, %s603_s12  }
 0x100   : > { %s365_s18 = scalar_lea.sflag [#allocation3], %s364_s11 }
 0x101   : > { %p490_p3 = pnand %p493_p2, %p696_p8 }
 0x103   : > { %598 = dma.done.wait (!%p490_p3), %s365_s18, 128  }
 0x104   : > { %600 = vsyncadd (!%p490_p3), %s365_s18, 4294967168  ;;  %s16_s17 = sadd.s32 1, %s623_s17   ;;  %s776_s12 = smov %s607_s13 }
 0x105   : > { %p13_p5 = scmp.ge.s32.totalorder %s16_s17, 4   ;;  %s777_s13 = smov %s611_s14 }
 0x106   : > { %s778_s14 = smov %s702_s25  ;;  %s779_s15 = smov %s619_s16 }
 0x107   : > { %s780_s16 = smov %s782_s20  ;;  %15 = sbr.rel (!%p13_p5) target bundleno = 4 (0x4), region = 73 }
 0x10e   :  { %370 = vsyncpa [#allocation3], 1 }
 0x10f   :  { %372 = vsyncpa [#allocation3 + $0x1], 1 }

// kernel: tpu_custom_call.1
= control target key start
LH: loop header
LB: loop body
LE: loop exit
PB: predicated region body
PF: predicated region fallthrough
CT: control target
= control target key end

     0   :  { %8 = vsyncpa [#allocation3], 0  ;;  %s770_s0 = inlined_call_operand.vmem [shape: f32[16,5], index: 0, kind: input, shape index: {}]   ;;  %s771_s1 = inlined_call_operand.vmem [shape: f32[12,5], index: 1, kind: input, shape index: {}]   ;;  %s772_s2 = inlined_call_operand.vmem [shape: f32[1,12], index: 2, kind: input, shape index: {}]   ;;  %s773_s3 = inlined_call_operand.hbm [shape: f32[16,12], index: 3, kind: output, shape index: {}]  }
   0x1   :  { %10 = vsyncpa [#allocation3 + $0x1], 0  ;;  %s649_s12 = smov 0   ;;  %s651_s13 = smov 0  }
   0x2   :  { %s653_s14 = smov 0   ;;  %s655_s15 = smov 0  }
   0x3   :  { %s657_s16 = smov 0   ;;  %s659_s17 = smov 0  }
   0x4 LB: > { %s456_s18 = sadd.s32 4294967295, %s623_s17   ;;  %s457_s19 = sadd.s32 4294967294, %s623_s17   ;;  %s623_s17 = sphi %s659_s17, %s16_s17   ;;  %s619_s16 = sphi %s657_s16, %s780_s16   ;;  %s615_s15 = sphi %s655_s15, %s779_s15   ;;  %s611_s14 = sphi %s653_s14, %s778_s14   ;;  %s607_s13 = sphi %s651_s13, %s777_s13   ;;  %s603_s12 = sphi %s649_s12, %s776_s12  }
   0x5   : > { %s35_s20 = sadd.s32 1, %s619_s16  ;;  %s126_s21 = sadd.s32 1, %s611_s14 }
   0x6   : > { %p37_p0 = scmp.ge.s32.totalorder %s35_s20, 2  ;;  %p136_p1 = scmp.ne.s32.totalorder %s611_s14, %s607_s13 }
   0x7   : > { %p137_p2 = scmp.eq.s32.totalorder %s456_s18, 1  ;;  %p142_p3 = scmp.ne.s32.totalorder %s607_s13, %s603_s12 }
   0x8   : > { %s782_s20 = smov (%p37_p0, %s35_s20), 0  ;;  %p143_p5 = scmp.eq.s32.totalorder %s457_s19, 1 }
   0x9   : > { %p689_p4 = por %p137_p2, %p136_p1  ;;  %s121_s23 = ssub.s32 %s619_s16, %s782_s20 }
   0xa   : > { %p462_p6 = scmp.ge.s32.totalorder %s623_s17, 1  ;;  %p124_p7 = scmp.eq.s32.totalorder %s121_s23, 0 }
   0xb   : > { %p696_p8 = por %p143_p5, %p142_p3  ;;  %p189_p9 = scmp.lt.s32.totalorder %s623_s17, 3 }
   0xc   : > { %s702_s25 = scalar_select %p124_p7, %s611_s14, %s126_s21  }
   0xd   : > { %p190_p10 = pnand %p462_p6, %p189_p9 }
   0xe   : > { %v246_v0 = vld [vmem:[%s771_s1] sm:$0xff] (!%p190_p10)  ;;  %v247_v1 = vld [vmem:[%s771_s1 + $0x8] sm:$0xf] (!%p190_p10)  ;;  %vm255_vm0 = vcmask (!%p190_p10), 39936   ;;  %v625_v2 = vmov (!%p190_p10), 0.0|0.0   ;;  %p226_p11 = scmp.lt.s32.totalorder (!%p190_p10), %s615_s15, 1 }
   0xf   : > { %193 = sbr.rel (%p190_p10) target bundleno = 255 (0xff), region = 32  ;;  %483 = vmatprep.subr.bf16.mxu0 (!%p190_p10), %v625_v2  ;;  %v484_v3 = vpack.c.bf16 (!%p190_p10), %v247_v1, %v246_v0  ;;  %vm485_vm1 = vmpackc.low (!%p190_p10), %vm255_vm0, %vm255_vm0  ;;  %vm626_vm2 = vmmov (!%p190_p10), 0   ;;  %v627_v4 = vmov (!%p190_p10), 0.0   ;;  %s223_s8 = sand.u32 (!%p190_p10), 1, %s607_s13   ;;  %v465_v6 = vld [vmem:[%s772_s2] ss:$0 sm:$0xff] (!%p190_p10) }
  0x10   : > { %480 = vmatprep.mubr.msk.f32.mxu0 (!%p190_p10), %vm626_vm2, %v627_v4  ;;  %s463_s9 = sshll.u32 (!%p190_p10), %s223_s8, 3  ;;  %s470_s18 = sshll.u32 (!%p190_p10), %s615_s15, 7  ;;  %vm335_vm3 = vcmask (!%p190_p10), 97280  }
  0x11   : > { %486 = vmatpush3.bf16.xpose.msk.msra.mxu0 (!%p190_p10), %vm485_vm1, %v484_v3  ;;  %s225_s19 = scalar_lea.vmem (!%p190_p10), [#allocation2], %s463_s9  ;;  %s723_s27 = scalar_lea.hbm (!%p190_p10), %s773_s3, %s470_s18 }
  0x12   : > { %s352_s21 = sshll.u32 (!%p190_p10), %s225_s19, 4  ;;  %s338_s28 = scalar_lea.sflag (!%p190_p10), [#allocation3], %s223_s8  ;;  %s725_s21 = int_to_ptr.vmem [resolvable:$true] %s352_s21 }
  0x13   : > { %s545_s29 = scalar_lea.vmem (!%p190_p10), %s725_s21, 128 }
  0x14   : > { %p546_p12 = scmp.ne.s32.totalorder (!%p190_p10), %s725_s21, %s545_s29 }
  0x16   : > { %s227_s30 = scalar_select %p226_p11, %s615_s15, 1 }
  0x17   : > { %p547_p13 = pnand %p546_p12, %p689_p4  ;;  %s628_s15 = smov [#allocation2]  }
  0x18   : > { %s464_s4 = sshll.u32 %s227_s30, 3  ;;  %s549_s30 = sshll.u32 %s628_s15, 4  ;;  %s550_s30 = int_to_ptr.vmem [resolvable:$false] %s549_s30 }
  0x19   : > { %s232_s7 = scalar_lea.vmem %s770_s0, %s464_s4  ;;  %p548_p0 = pneg %p547_p13 }
  0x1a   : > { %v245_v5 = vld [vmem:[%s232_s7] sm:$0xff]  ;;  %s551_s4 = scalar_lea.vmem %s550_s30, 256  ;;  %p552_p1 = scmp.lt.s32.totalorder %s725_s21, %s550_s30 }
  0x1b   : > { %481 = vmatmul.mubr.msk.f32.vlgmr.msra.gmra.mrb[0].mxu0 %vm255_vm0, %v245_v5  ;;  %p553_p2 = scmp.lt.s32.totalorder %s551_s4, %s545_s29 }
  0x1d   : > { %p554_p3 = por %p553_p2, %p552_p1 }
  0x1f   : > { %p555_p5 = pnand %p554_p3, %p548_p0 }
  0xee   : > { %v331_v7 = vpop.f32.mrb[0].mxu0 }
  0xef   : > { %v332_v8 = vadd.f32 %v465_v6, %v331_v7  ;;  %v482_v9 = vpop.f32.mrb[1].mxu0 }
  0xf1   : > { %336 = vst.msk [vmem:[%s225_s19] sm:$0xff] %vm335_vm3, %v332_v8 }
  0xf2   : > { %558 = shalt.err (!%p555_p5)
}
  0xf3   : > { %s559_s5 = scalar_lea.hbm %s723_s27, 128  ;;  %s563_s8 = scalar_lea.hbm %s773_s3, 256 }
  0xf4   : > { %p560_p6 = scmp.ne.s32.totalorder %s723_s27, %s559_s5  ;;  %p564_p10 = scmp.lt.u32.totalorder %s723_s27, %s773_s3 }
  0xf5   : > { %p565_p11 = scmp.lt.u32.totalorder %s563_s8, %s559_s5  ;;  %p567_p13 = scmp.lt.u32.totalorder %s559_s5, %s723_s27 }
  0xf6   : > { %p561_p7 = pnand %p560_p6, %p689_p4 }
  0xf7   : > { %p566_p12 = por %p565_p11, %p564_p10 }
  0xf8   : > { %p562_p9 = pneg %p561_p7 }
  0xf9   : > { %p568_p0 = por %p567_p13, %p566_p12 }
  0xfb   : > { %p569_p1 = pnand %p568_p0, %p562_p9 }
  0xfd   : > { %572 = shalt.err (!%p569_p1)
}
  0xfe   : > { %487 = dma.vmem_to_hbm [thread:$0]  (%p689_p4), %s725_s21, 128, %s723_s27, %s338_s28  }
  0xff PF: > { %p493_p2 = scmp.ge.s32.totalorder %s623_s17, 2  ;;  %s364_s11 = sand.u32 1, %s603_s12  }
 0x100   : > { %s365_s18 = scalar_lea.sflag [#allocation3], %s364_s11 }
 0x101   : > { %p490_p3 = pnand %p493_p2, %p696_p8 }
 0x103   : > { %598 = dma.done.wait (!%p490_p3), %s365_s18, 128  }
 0x104   : > { %600 = vsyncadd (!%p490_p3), %s365_s18, 4294967168  ;;  %s16_s17 = sadd.s32 1, %s623_s17   ;;  %s776_s12 = smov %s607_s13 }
 0x105   : > { %p13_p5 = scmp.ge.s32.totalorder %s16_s17, 4   ;;  %s777_s13 = smov %s611_s14 }
 0x106   : > { %s778_s14 = smov %s702_s25  ;;  %s779_s15 = smov %s619_s16 }
 0x107   : > { %s780_s16 = smov %s782_s20  ;;  %15 = sbr.rel (!%p13_p5) target bundleno = 4 (0x4), region = 73 }
 0x10e   :  { %370 = vsyncpa [#allocation3], 1 }
 0x10f   :  { %372 = vsyncpa [#allocation3 + $0x1], 1 }

</bundles_post_ra>
